<compile_context>
chip_gen: v6e
topology: v6e:2x2x1
jax: 0.10.0
libtpu: 0.0.40
codegen_flags: <defaults>
</compile_context>

<pallas_src>
import functools

import jax
import jax.numpy as jnp
from jax.experimental import pallas as pl
from jax.experimental.pallas import tpu as pltpu

LANES = 128                           # lane width of the flattened slab
SUBLANES = 8                          # f32 sublane tile
TILE_ROWS = 4096                      # 4096*128*4B = 2 MiB per f32 block buffer
VMEM_LIMIT_BYTES = 32 * 1024 * 1024   # explicit budget, safe on v5e/v6e/v7x
FUSED_MAX_SLAB_BYTES = 3 * 1024 * 1024  # whole-slab-resident single-pass threshold


def _round_up(x, m):
    return ((x + m - 1) // m) * m


# ----------------------------------------------------------------------------
# Fused single-pass kernel: min/max + params + quantize, whole slab in VMEM.
# ----------------------------------------------------------------------------
def _fused_measure_quant_kernel(tail_ref, x_ref, params_ref, o_ref, *, levels):
    x = x_ref[...].astype(jnp.float32)
    a = jnp.minimum(jnp.min(x), tail_ref[0])
    b = jnp.maximum(jnp.max(x), tail_ref[1])
    s = jnp.maximum((b - a) / jnp.float32(levels), jnp.float32(1e-8))
    inv_s = jnp.float32(1.0) / s
    params_ref[0] = a
    params_ref[1] = b
    params_ref[2] = s
    params_ref[3] = inv_s
    q = jnp.round((jnp.clip(x, a, b) - a) * inv_s)
    o_ref[...] = (q * s + a).astype(o_ref.dtype)


def _pallas_fused(body2d, tail_mm, num_bits):
    R, L = body2d.shape
    kernel = functools.partial(_fused_measure_quant_kernel,
                               levels=float(2 ** num_bits - 1))
    return pl.pallas_call(
        kernel,
        out_shape=(jax.ShapeDtypeStruct((4,), jnp.float32),
                   jax.ShapeDtypeStruct((R, L), body2d.dtype)),
        in_specs=[pl.BlockSpec(memory_space=pltpu.MemorySpace.SMEM),
                  pl.BlockSpec(memory_space=pltpu.MemorySpace.VMEM)],
        out_specs=(pl.BlockSpec(memory_space=pltpu.MemorySpace.SMEM),
                   pl.BlockSpec(memory_space=pltpu.MemorySpace.VMEM)),
        compiler_params=pltpu.CompilerParams(
            vmem_limit_bytes=VMEM_LIMIT_BYTES),
    )(tail_mm, body2d)


# ----------------------------------------------------------------------------
# Two-pass kernel 1: tiled min/max reduction -> (a, b, s, 1/s) params vector.
# Vector (8,128) accumulators; cross-lane reduce only at finalize; ragged-row
# mask only on the last block (and compiled out when rows % tile == 0).
# ----------------------------------------------------------------------------
def _minmax_params_kernel(tail_ref, x_ref, params_ref, min_acc, max_acc, *,
                          levels, rows_total, tile_r):
    i = pl.program_id(0)
    nb = pl.num_programs(0)

    @pl.when(i == 0)
    def _init():
        min_acc[...] = jnp.full_like(min_acc, jnp.inf)
        max_acc[...] = jnp.full_like(max_acc, -jnp.inf)

    x = x_ref[...].astype(jnp.float32)

    def _accumulate(x_for_min, x_for_max):
        xm = x_for_min.reshape(-1, SUBLANES, LANES)
        xM = x_for_max.reshape(-1, SUBLANES, LANES)
        min_acc[...] = jnp.minimum(min_acc[...], jnp.min(xm, axis=0))
        max_acc[...] = jnp.maximum(max_acc[...], jnp.max(xM, axis=0))

    if rows_total % tile_r == 0:
        # every block is full: steady-state path has no mask arithmetic at all
        _accumulate(x, x)
    else:
        @pl.when(i < nb - 1)
        def _steady():
            _accumulate(x, x)

        @pl.when(i == nb - 1)
        def _ragged_last():
            row = jax.lax.broadcasted_iota(jnp.int32, x.shape, 0)
            valid = (i * tile_r + row) < rows_total
            _accumulate(jnp.where(valid, x, jnp.float32(jnp.inf)),
                        jnp.where(valid, x, jnp.float32(-jnp.inf)))

    @pl.when(i == nb - 1)
    def _finalize():
        a = jnp.minimum(jnp.min(min_acc[...]), tail_ref[0])
        b = jnp.maximum(jnp.max(max_acc[...]), tail_ref[1])
        s = jnp.maximum((b - a) / jnp.float32(levels), jnp.float32(1e-8))
        params_ref[0] = a
        params_ref[1] = b
        params_ref[2] = s
        params_ref[3] = jnp.float32(1.0) / s


def _pallas_minmax_params(body2d, tail_mm, num_bits):
    R, L = body2d.shape
    tile_r = min(TILE_ROWS, _round_up(R, SUBLANES))
    grid = (pl.cdiv(R, tile_r),)
    kernel = functools.partial(_minmax_params_kernel,
                               levels=float(2 ** num_bits - 1),
                               rows_total=R, tile_r=tile_r)
    return pl.pallas_call(
        kernel,
        out_shape=jax.ShapeDtypeStruct((4,), jnp.float32),
        grid=grid,
        in_specs=[pl.BlockSpec(memory_space=pltpu.MemorySpace.SMEM),
                  pl.BlockSpec((tile_r, L), lambda i: (i, 0))],
        out_specs=pl.BlockSpec(memory_space=pltpu.MemorySpace.SMEM),
        scratch_shapes=[pltpu.VMEM((SUBLANES, LANES), jnp.float32),
                        pltpu.VMEM((SUBLANES, LANES), jnp.float32)],
        compiler_params=pltpu.CompilerParams(
            dimension_semantics=("arbitrary",),
            vmem_limit_bytes=VMEM_LIMIT_BYTES),
    )(tail_mm, body2d)


# ----------------------------------------------------------------------------
# Two-pass kernel 2: elementwise fake quantization from an SMEM params vector.
# ----------------------------------------------------------------------------
def _quantize_kernel(params_ref, x_ref, o_ref):
    a = params_ref[0]
    b = params_ref[1]
    s = params_ref[2]
    inv_s = params_ref[3]
    x = x_ref[...].astype(jnp.float32)
    q = jnp.round((jnp.clip(x, a, b) - a) * inv_s)
    o_ref[...] = (q * s + a).astype(o_ref.dtype)


def _pallas_quantize(body2d, params):
    R, L = body2d.shape
    tile_r = min(TILE_ROWS, _round_up(R, SUBLANES))
    grid = (pl.cdiv(R, tile_r),)
    return pl.pallas_call(
        _quantize_kernel,
        out_shape=jax.ShapeDtypeStruct((R, L), body2d.dtype),
        grid=grid,
        in_specs=[pl.BlockSpec(memory_space=pltpu.MemorySpace.SMEM),
                  pl.BlockSpec((tile_r, L), lambda i: (i, 0))],
        out_specs=pl.BlockSpec((tile_r, L), lambda i: (i, 0)),
        compiler_params=pltpu.CompilerParams(
            dimension_semantics=("parallel",),
            vmem_limit_bytes=VMEM_LIMIT_BYTES),
    )(params, body2d)


# ----------------------------------------------------------------------------
# Glue: slab splitting (no full-tensor pad), jitted forward variants, EMA stats.
# ----------------------------------------------------------------------------
def _split_slab(x):
    """Split flat x into a lane-dense (n//128, 128) body + a (<128,) tail."""
    flat = x.reshape(-1)
    n = flat.shape[0]
    n_body = (n // LANES) * LANES
    body = flat[:n_body].reshape(n_body // LANES, LANES) if n_body else None
    tail = flat[n_body:]
    return body, tail, flat


def _quantize_jnp(x, a, b, s, inv_s):
    xf = x.astype(jnp.float32)
    q = jnp.round((jnp.clip(xf, a, b) - a) * inv_s)
    return (q * s + a).astype(x.dtype)


def _quantize_with_params(x, a, b, s):
    inv_s = jnp.float32(1.0) / s
    body, tail, flat = _split_slab(x)
    if body is None:
        return _quantize_jnp(flat, a, b, s, inv_s).reshape(x.shape)
    params = jnp.stack([a, b, s, inv_s]).astype(jnp.float32)
    q_body = _pallas_quantize(body, params)
    if tail.shape[0] > 0:
        q_tail = _quantize_jnp(tail, a, b, s, inv_s)
        return jnp.concatenate([q_body.reshape(-1), q_tail]).reshape(x.shape)
    return q_body.reshape(x.shape)


@functools.partial(jax.jit, static_argnames=("num_bits", "momentum"))
def _forward_measure(x, running_a, running_b, *, num_bits, momentum):
    body, tail, flat = _split_slab(x)
    has_tail = tail.shape[0] > 0
    levels = float(2 ** num_bits - 1)

    if body is None:
        # Tiny tensor (< 128 elements): a kernel launch can't win here.
        xf = flat.astype(jnp.float32)
        a = jnp.min(xf)
        b = jnp.max(xf)
        s = jnp.maximum((b - a) / levels, jnp.float32(1e-8))
        q = _quantize_jnp(flat, a, b, s, jnp.float32(1.0) / s).reshape(x.shape)
    else:
        if has_tail:
            tf = tail.astype(jnp.float32)
            tail_mm = jnp.stack([jnp.min(tf), jnp.max(tf)]).astype(jnp.float32)
        else:
            tail_mm = jnp.array([jnp.inf, -jnp.inf], jnp.float32)

        slab_bytes = body.size * body.dtype.itemsize
        if slab_bytes <= FUSED_MAX_SLAB_BYTES:
            params, q_body = _pallas_fused(body, tail_mm, num_bits)
        else:
            params = _pallas_minmax_params(body, tail_mm, num_bits)
            q_body = _pallas_quantize(body, params)

        a = params[0]
        b = params[1]
        if has_tail:
            q_tail = _quantize_jnp(tail, a, b, params[2], params[3])
            q = jnp.concatenate([q_body.reshape(-1), q_tail]).reshape(x.shape)
        else:
            q = q_body.reshape(x.shape)

    new_a = (running_a * momentum + a * (1.0 - momentum)).astype(running_a.dtype)
    new_b = (running_b * momentum + b * (1.0 - momentum)).astype(running_b.dtype)
    return q, new_a, new_b


@functools.partial(jax.jit, static_argnames=("momentum",))
def _forward_given(x, running_a, running_b, a, b, s, *, momentum):
    q = _quantize_with_params(x, a, b, s)
    new_a = (running_a * momentum + a * (1.0 - momentum)).astype(running_a.dtype)
    new_b = (running_b * momentum + b * (1.0 - momentum)).astype(running_b.dtype)
    return q, new_a, new_b


@functools.partial(jax.jit, static_argnames=("num_bits",))
def _forward_eval(x, running_a, running_b, *, num_bits):
    a = running_a.reshape(-1)[0].astype(jnp.float32)
    b = running_b.reshape(-1)[0].astype(jnp.float32)
    s = jnp.maximum((b - a) / float(2 ** num_bits - 1), jnp.float32(1e-8))
    return _quantize_with_params(x, a, b, s)


def _qp_get(qparams, name):
    if isinstance(qparams, dict):
        return qparams.get(name, None)
    return getattr(qparams, name, None)


class QuantMeasure:
    """JAX/Pallas port of the PyTorch QuantMeasure forward pass."""

    def __init__(self, num_bits=8, shape_measure=(1,), inplace=False,
                 momentum=0.1):
        # deterministic buffer init (matches torch.zeros in __init__)
        self.running_a = jnp.zeros(shape_measure, jnp.float32)
        self.running_b = jnp.zeros(shape_measure, jnp.float32)
        self.momentum = float(momentum)
        self.num_bits = int(num_bits)
        # TODO(synk): true in-place (mark_dirty) has no equivalent on a
        # non-donated JAX array; `inplace` is accepted but is a no-op.
        self.inplace = inplace
        self.training = True

    def __call__(self, x, qparams=None):
        if self.training:
            if qparams is None:
                q, self.running_a, self.running_b = _forward_measure(
                    x, self.running_a, self.running_b,
                    num_bits=self.num_bits, momentum=self.momentum)
                return q
            # TODO(synk): per-channel (array-valued) qparams are collapsed to
            # scalars, matching the scalar .item() semantics of the reference.
            a = jnp.asarray(_qp_get(qparams, "a"), jnp.float32).reshape(-1)[0]
            b = jnp.asarray(_qp_get(qparams, "b"), jnp.float32).reshape(-1)[0]
            s_user = _qp_get(qparams, "s")
            if s_user is not None:
                s = jnp.asarray(s_user, jnp.float32).reshape(-1)[0]
            else:
                s = jnp.maximum((b - a) / float(2 ** self.num_bits - 1),
                                jnp.float32(1e-8))
            q, self.running_a, self.running_b = _forward_given(
                x, self.running_a, self.running_b, a, b, s,
                momentum=self.momentum)
            return q
        return _forward_eval(x, self.running_a, self.running_b,
                             num_bits=self.num_bits)


# ----------------------------------------------------------------------------
# Self-test
# ----------------------------------------------------------------------------
def _reference_quant(x, num_bits, a=None, b=None):
    xf = x.astype(jnp.float32)
    if a is None:
        a = jnp.min(xf)
    if b is None:
        b = jnp.max(xf)
    a = jnp.float32(a)
    b = jnp.float32(b)
    s = jnp.maximum((b - a) / float(2 ** num_bits - 1), jnp.float32(1e-8))
    inv_s = jnp.float32(1.0) / s
    q = jnp.round((jnp.clip(xf, a, b) - a) * inv_s)
    return (q * s + a).astype(x.dtype), a, b


if __name__ == "__main__":
    key = jax.random.PRNGKey(0)
    k1, k2, k3, k4 = jax.random.split(key, 4)

    # main case: NCHW activation (fused single-pass path, no ragged tail)
    x = jax.random.normal(k1, (2, 4, 16, 16), dtype=jnp.float32)
    qm = QuantMeasure(num_bits=8, shape_measure=(1,), momentum=0.1)
    qm.training = True
    out = jax.block_until_ready(qm(x))
    ref, a_ref, b_ref = _reference_quant(x, 8)
    assert out.shape == x.shape and out.dtype == x.dtype
    assert bool(jnp.allclose(out, ref, rtol=1e-5, atol=1e-5))
    # running-stat update (momentum 0.1, buffers start at zero -> 0.9 * stat)
    assert bool(jnp.allclose(qm.running_a, 0.9 * a_ref, rtol=1e-5, atol=1e-6))
    assert bool(jnp.allclose(qm.running_b, 0.9 * b_ref, rtol=1e-5, atol=1e-6))

    # ragged case: numel not divisible by 128 (tail handled outside kernels)
    x2 = jax.random.normal(k2, (3, 5, 7, 9), dtype=jnp.float32)
    qm2 = QuantMeasure(num_bits=8)
    out2 = jax.block_until_ready(qm2(x2))
    ref2, _, _ = _reference_quant(x2, 8)
    assert out2.shape == x2.shape
    assert bool(jnp.allclose(out2, ref2, rtol=1e-5, atol=1e-5))

    # two-pass path: slab larger than the fused VMEM threshold, rows not a
    # multiple of the tile -> exercises the masked final block + vector accs
    x3 = jax.random.normal(k3, (8200, 128), dtype=jnp.float32)
    qm3 = QuantMeasure(num_bits=8)
    out3 = jax.block_until_ready(qm3(x3))
    ref3, _, _ = _reference_quant(x3, 8)
    assert out3.shape == x3.shape
    assert bool(jnp.allclose(out3, ref3, rtol=1e-5, atol=1e-5))

    # training with user-supplied qparams (quantize-only kernel path)
    x4 = jax.random.normal(k4, (4, 5, 128), dtype=jnp.float32)
    qm4 = QuantMeasure(num_bits=8)
    out4 = jax.block_until_ready(qm4(x4, qparams={"a": -1.0, "b": 1.0}))
    ref4, _, _ = _reference_quant(x4, 8, a=-1.0, b=1.0)
    assert out4.shape == x4.shape
    assert bool(jnp.allclose(out4, ref4, rtol=1e-5, atol=1e-5))
    assert bool(jnp.allclose(qm4.running_a, jnp.float32(-0.9), atol=1e-6))
    assert bool(jnp.allclose(qm4.running_b, jnp.float32(0.9), atol=1e-6))

    # eval-mode path (uses running buffers, stays on device)
    qm.training = False
    out_eval = jax.block_until_ready(qm(x))
    assert out_eval.shape == x.shape and out_eval.dtype == x.dtype
    assert bool(jnp.all(jnp.isfinite(out_eval)))

    print("KERNEL_OK")
</pallas_src>

<mosaic_0001>
module attributes {stable_mosaic.version = 11 : i64} {
  func.func @_fused_measure_quant_kernel(%arg0: memref<2xf32, #tpu.memory_space<smem>>, %arg1: memref<16x128xf32, #tpu.memory_space<vmem>>, %arg2: memref<4xf32, #tpu.memory_space<smem>>, %arg3: memref<16x128xf32, #tpu.memory_space<vmem>>) attributes {dimension_semantics = [], scalar_prefetch = 0 : i64, scratch_operands = 0 : i64, tpu.core_type = #tpu.core_type<tc>} {
    %c0 = arith.constant 0 : index
    %c0_0 = arith.constant 0 : index
    %0 = vector.load %arg1[%c0, %c0_0] : memref<16x128xf32, #tpu.memory_space<vmem>>, vector<16x128xf32>
    %1 = vector.shape_cast %0 : vector<16x128xf32> to vector<1x16x128xf32>
    %cst = arith.constant dense<0x7F800000> : vector<1xf32>
    %2 = vector.multi_reduction <minimumf>, %1, %cst [1, 2] : vector<1x16x128xf32> to vector<1xf32>
    %3 = vector.shape_cast %2 : vector<1xf32> to vector<1x1x1xf32>
    %4 = vector.extract %3[0, 0, 0] : f32 from vector<1x1x1xf32>
    %c0_1 = arith.constant 0 : index
    %5 = memref.load %arg0[%c0_1] : memref<2xf32, #tpu.memory_space<smem>>
    %6 = arith.minimumf %4, %5 : f32
    %7 = vector.shape_cast %0 : vector<16x128xf32> to vector<1x16x128xf32>
    %cst_2 = arith.constant dense<0xFF800000> : vector<1xf32>
    %8 = vector.multi_reduction <maximumf>, %7, %cst_2 [1, 2] : vector<1x16x128xf32> to vector<1xf32>
    %9 = vector.shape_cast %8 : vector<1xf32> to vector<1x1x1xf32>
    %10 = vector.extract %9[0, 0, 0] : f32 from vector<1x1x1xf32>
    %c1 = arith.constant 1 : index
    %11 = memref.load %arg0[%c1] : memref<2xf32, #tpu.memory_space<smem>>
    %12 = arith.maximumf %10, %11 : f32
    %13 = arith.subf %12, %6 : f32
    %cst_3 = arith.constant 2.550000e+02 : f32
    %14 = arith.divf %13, %cst_3 : f32
    %cst_4 = arith.constant 9.99999993E-9 : f32
    %15 = arith.maximumf %14, %cst_4 : f32
    %cst_5 = arith.constant 1.000000e+00 : f32
    %16 = arith.divf %cst_5, %15 : f32
    %c0_6 = arith.constant 0 : index
    %17 = memref.load %arg2[%c0_6] : memref<4xf32, #tpu.memory_space<smem>>
    memref.store %6, %arg2[%c0_6] : memref<4xf32, #tpu.memory_space<smem>>
    %c1_7 = arith.constant 1 : index
    %18 = memref.load %arg2[%c1_7] : memref<4xf32, #tpu.memory_space<smem>>
    memref.store %12, %arg2[%c1_7] : memref<4xf32, #tpu.memory_space<smem>>
    %c2 = arith.constant 2 : index
    %19 = memref.load %arg2[%c2] : memref<4xf32, #tpu.memory_space<smem>>
    memref.store %15, %arg2[%c2] : memref<4xf32, #tpu.memory_space<smem>>
    %c3 = arith.constant 3 : index
    %20 = memref.load %arg2[%c3] : memref<4xf32, #tpu.memory_space<smem>>
    memref.store %16, %arg2[%c3] : memref<4xf32, #tpu.memory_space<smem>>
    %21 = vector.broadcast %6 : f32 to vector<16x128xf32>
    %22 = arith.maximumf %21, %0 : vector<16x128xf32>
    %23 = vector.broadcast %12 : f32 to vector<16x128xf32>
    %24 = arith.minimumf %23, %22 : vector<16x128xf32>
    %25 = vector.broadcast %6 : f32 to vector<16x128xf32>
    %26 = arith.subf %24, %25 : vector<16x128xf32>
    %27 = vector.broadcast %16 : f32 to vector<16x128xf32>
    %28 = arith.mulf %26, %27 : vector<16x128xf32>
    %29 = math.roundeven %28 : vector<16x128xf32>
    %30 = vector.broadcast %15 : f32 to vector<16x128xf32>
    %31 = arith.mulf %29, %30 : vector<16x128xf32>
    %32 = vector.broadcast %6 : f32 to vector<16x128xf32>
    %33 = arith.addf %31, %32 : vector<16x128xf32>
    %c0_8 = arith.constant 0 : index
    %c0_9 = arith.constant 0 : index
    %34 = vector.load %arg3[%c0_8, %c0_9] : memref<16x128xf32, #tpu.memory_space<vmem>>, vector<16x128xf32>
    tpu.vector_store %arg3[%c0_8, %c0_9], %33 {strides = array<i32>} : memref<16x128xf32, #tpu.memory_space<vmem>>, vector<16x128xf32>,
    return
  }
}

</mosaic_0001>

<bundles_post_ra>
// kernel: _forward_measure.1
= control target key start
LH: loop header
LB: loop body
LE: loop exit
PB: predicated region body
PF: predicated region fallthrough
CT: control target
= control target key end

     0   :  { %9 = vsyncpa [#allocation3], 0  ;;  %s206_s0 = inlined_call_operand.vmem [shape: f32[2], index: 0, kind: input, shape index: {}]   ;;  %s207_s1 = inlined_call_operand.vmem [shape: f32[16,128], index: 1, kind: input, shape index: {}]   ;;  %s208_s2 = inlined_call_operand.vmem [shape: f32[4], index: 2, kind: output, shape index: {0}]   ;;  %s209_s3 = inlined_call_operand.vmem [shape: f32[16,128], index: 3, kind: output, shape index: {1}]  }
   0x1   :  { %10 = vsyncpa [#allocation4], 0  ;;  %s17_s14 = sshll.u32 %s206_s0, 4  ;;  %s18_s14 = int_to_ptr.vmem [resolvable:$true] %s17_s14 }
   0x2   :  { %s137_s15 = scalar_lea.vmem %s18_s14, 16  ;;  %p142_p1 = scmp.lt.s32.totalorder %s18_s14, %s18_s14 }
   0x3   :  { %p138_p0 = scmp.ne.s32.totalorder %s18_s14, %s137_s15  ;;  %p143_p2 = scmp.lt.s32.totalorder %s137_s15, %s137_s15 }
   0x5   :  { %p144_p3 = por %p143_p2, %p142_p1 }
   0x7   :  { %p145_p4 = pnand %p144_p3, %p138_p0 }
   0x9   :  { %148 = shalt.err (!%p145_p4)
}
   0xa   :  { %s165_s16 = smov [#allocation2]  }
   0xb   :  { %20 = dma.vmem_to_smem %s18_s14, 16, %s165_s16, [#allocation3]  }
   0xc   :  { %161 = dma.done.wait [#allocation3], 16  }
   0xd   :  { %162 = vsyncadd [#allocation3], 4294967280 }
   0xe   :  { %26 = sfence }
   0xf   :  { %v27_v0 = vld [vmem:[%s207_s1] sm:$0xff]  ;;  %v28_v1 = vld [vmem:[%s207_s1 + $0x8] sm:$0xff]  ;;  %s39_s0 = sld [smem:[#allocation2]]  ;;  %s166_s27 = smov 1e-08  }
  0x10   :  { %v29_v2 = vmin.f32 %v27_v0, %v28_v1  ;;  %v41_v3 = vmax.f32 %v27_v0, %v28_v1  ;;  %s109_s1 = sld [smem:[#allocation2 + $0x1]]  ;;  %s95_s4 = sshll.u32 %s208_s2, 4  ;;  %s96_s4 = int_to_ptr.vmem [resolvable:$true] %s95_s4 }
  0x11   :  { %s149_s6 = scalar_lea.vmem %s96_s4, 16  ;;  %p154_p6 = scmp.lt.s32.totalorder %s96_s4, %s96_s4 }
  0x12   :  { %30 = vmin.xlane.f32.xlu0 %v29_v2  ;;  %p150_p5 = scmp.ne.s32.totalorder %s96_s4, %s149_s6  ;;  %p155_p7 = scmp.lt.s32.totalorder %s149_s6, %s149_s6 }
  0x14   :  { %p156_p8 = por %p155_p7, %p154_p6 }
  0x16   :  { %42 = vmax.xlane.f32.xlu0 %v41_v3  ;;  %p157_p9 = pnand %p156_p8, %p150_p5 }
  0x9b   :  { %v31_v4 = vpop.xlane.xlu0 %30 }
  0x9c   :  { %v32_v5 = vrot.slane %v31_v4, 4 }
  0x9e   :  { %v33_v6 = vmin.f32 %v31_v4, %v32_v5 }
  0x9f   :  { %v43_v7 = vpop.xlane.xlu0 %42 }
  0xa0   :  { %v34_v8 = vrot.slane %v33_v6, 2  ;;  %v44_v9 = vrot.slane %v43_v7, 4 }
  0xa2   :  { %v45_v10 = vmax.f32 %v43_v7, %v44_v9  ;;  %v35_v11 = vmin.f32 %v33_v6, %v34_v8 }
  0xa4   :  { %v46_v12 = vrot.slane %v45_v10, 2  ;;  %v36_v13 = vrot.slane %v35_v11, 1 }
  0xa6   :  { %v47_v14 = vmax.f32 %v45_v10, %v46_v12  ;;  %v37_v15 = vmin.f32 %v35_v11, %v36_v13 }
  0xa8   :  { %110 = vpush %v37_v15  ;;  %v48_v16 = vrot.slane %v47_v14, 1 }
  0xaa   :  { %v49_v17 = vmax.f32 %v47_v14, %v48_v16 }
  0xac   :  { %112 = vpush %v49_v17 }
  0xd9   :  { %s111_s21 = spop %110 }
  0xda   :  { %s40_s22 = smin.f32 %s111_s21, %s39_s0 }
  0xdb   :  { %62 = sst [smem:[#allocation5]] %s40_s22  ;;  %v69_v18 = vstv %s40_s22 }
  0xdc   :  { %v70_v19 = vmax.f32 %v69_v18, %v27_v0  ;;  %v71_v20 = vmax.f32 %v69_v18, %v28_v1 }
  0xdd   :  { %s113_s23 = spop %112 }
  0xde   :  { %s52_s24 = smax.f32 %s113_s23, %s109_s1 }
  0xdf   :  { %s53_s25 = ssub.f32 %s52_s24, %s40_s22  ;;  %v72_v21 = vstv %s52_s24 }
  0xe0   :  { %64 = sst [smem:[#allocation5 + $0x1]] %s52_s24  ;;  %v73_v22 = vmin.f32 %v72_v21, %v70_v19  ;;  %v74_v23 = vmin.f32 %v72_v21, %v71_v20 }
  0xe1   :  { %s56_s26 = smul.f32 0.003921569, %s53_s25 }
  0xe2   :  { %v75_v24 = vsub.f32 %v73_v22, %v69_v18  ;;  %v76_v25 = vsub.f32 %v74_v23, %v69_v18 }
  0xe3   :  { %s57_s28 = smax.f32 %s166_s27, %s56_s26 }
  0xe4   :  { %v58_v26 = vstv %s57_s28  ;;  %66 = sst [smem:[#allocation5 + $0x2]] %s57_s28 }
  0xe5   :  { %135 = vrcp.f32 %v58_v26 }
  0xf2   :  { %v136_v27 = vpop.eup %135 }
  0xf3   :  { %114 = vpush %v136_v27 }
 0x124   :  { %s115_s5 = spop %114 }
 0x125   :  { %68 = sst [smem:[#allocation5 + $0x3]] %s115_s5  ;;  %v77_v28 = vstv %s115_s5 }
 0x126   :  { %v78_v29 = vmul.f32 %v77_v28, %v75_v24  ;;  %v79_v30 = vmul.f32 %v77_v28, %v76_v25 }
 0x127   :  { %160 = shalt.err (!%p157_p9)
}
 0x128   :  { %s167_s7 = smov [#allocation5]   ;;  %v118_v31 = vcvt.f32.s32 %v78_v29  ;;  %v126_v32 = vcvt.f32.s32 %v79_v30  ;;  %v116_v34 = vand.u32 2147483647, %v78_v29  ;;  %v121_v37 = vand.u32 2147483648, %v78_v29 }
 0x129   :  { %98 = dma.smem_to_vmem %s167_s7, 16, %s96_s4, [#allocation4]   ;;  %v124_v38 = vand.u32 2147483647, %v79_v30  ;;  %v129_v40 = vand.u32 2147483648, %v79_v30 }
 0x12a   :  { %v119_v33 = vcvt.s32.f32 %v118_v31  ;;  %v127_v35 = vcvt.s32.f32 %v126_v32  ;;  %vm117_vm0 = vcmp.lt.f32.partialorder %v116_v34, 8388608.0 }
 0x12b   :  { %vm125_vm1 = vcmp.lt.f32.partialorder %v124_v38, 8388608.0 }
 0x12c   :  { %v120_v36 = vand.u32 2147483647, %v119_v33  ;;  %v128_v39 = vand.u32 2147483647, %v127_v35 }
 0x12e   :  { %v122_v41 = vor.u32 %v121_v37, %v120_v36  ;;  %v130_v42 = vor.u32 %v129_v40, %v128_v39 }
 0x130   :  { %v123_v43 = vsel %vm117_vm0, %v122_v41, %v78_v29  ;;  %v131_v44 = vsel %vm125_vm1, %v130_v42, %v79_v30 }
 0x131   :  { %v83_v45 = vmul.f32 %v123_v43, %v58_v26  ;;  %v84_v46 = vmul.f32 %v131_v44, %v58_v26 }
 0x133   :  { %v85_v47 = vadd.f32 %v83_v45, %v69_v18  ;;  %v86_v48 = vadd.f32 %v84_v46, %v69_v18 }
 0x135   :  { %87 = vst [vmem:[%s209_s3] sm:$0xff] %v85_v47  ;;  %88 = vst [vmem:[%s209_s3 + $0x8] sm:$0xff] %v86_v48 }
 0x136   :  { %163 = dma.done.wait [#allocation4], 16  }
 0x137   :  { %164 = vsyncadd [#allocation4], 4294967280 }
 0x138   :  { %106 = sfence }
 0x139   :  { %107 = vsyncpa [#allocation3], 1 }
 0x13a   :  { %108 = vsyncpa [#allocation4], 1 }

</bundles_post_ra>
